<compile_context>
chip_gen: v7x
topology: tpu7x:2x2x1
jax: 0.10.0
libtpu: 0.0.40
codegen_flags: <defaults>
</compile_context>

<pallas_src>
import jax
import jax.numpy as jnp
from jax.experimental import pallas as pl
from jax.experimental.pallas import tpu as pltpu

_SUBLANES = 8
_VMEM_TILE_BUDGET = 12 << 20  # keep streamed tiles under v5e's 16 MiB default


def _round_up(x, m):
    return ((x + m - 1) // m) * m


def _round_down(x, m):
    return (x // m) * m


def proto_mlp_kernel(x_ref, w1_ref, b1_ref, w2_ref, b2_ref, o_ref):
    """o = relu(x @ w1 + b1) @ w2 + b2 for one batch tile.

    x stays f32 in HBM; it is cast to the (resident) weight dtype in-kernel so
    bf16 MXU operands do not add any extra HBM traffic. Both matmuls
    accumulate in f32 on the MXU; bias + ReLU run in f32 on the VPU.
    """
    x = x_ref[...].astype(w1_ref.dtype)
    h = jnp.dot(x, w1_ref[...], preferred_element_type=jnp.float32)
    h = jnp.maximum(h + b1_ref[...], 0.0)          # bias + F.relu in f32
    h = h.astype(w2_ref.dtype)                     # match MXU operand dtype
    o = jnp.dot(h, w2_ref[...], preferred_element_type=jnp.float32)
    o_ref[...] = (o + b2_ref[...]).astype(o_ref.dtype)


def proto_network_forward(x, w1, b1, w2, b2, *, block_batch=4096,
                          use_bf16=False, out_dtype=jnp.float32):
    """Pallas forward: relu(x @ w1 + b1) @ w2 + b2 (identity out_fn).

    Tiles only over batch; w1/b1/w2/b2 (~12 KiB at these dims) stay
    VMEM-resident across all grid steps.
    """
    B, in_dim = x.shape
    hidden_dim = w1.shape[1]
    out_dim = w2.shape[1]

    # Resident weights may be pre-cast to bf16 (read from HBM exactly once);
    # x is NOT pre-cast -- the kernel casts the streamed tile instead.
    if use_bf16:
        w1_mxu = w1.astype(jnp.bfloat16)
        w2_mxu = w2.astype(jnp.bfloat16)
    else:
        w1_mxu, w2_mxu = w1, w2

    # ---- batch tile selection ------------------------------------------------
    # Per-row VMEM footprint of the streamed/temporary data (double-buffered
    # x and out tiles + f32 hidden activation); cap tm so it stays inside the
    # scoped-VMEM budget on every TPU generation (v5e is the tightest).
    per_row_bytes = (2 * in_dim * 4            # x tile, double-buffered (f32)
                     + 2 * out_dim * 4         # out tile, double-buffered
                     + hidden_dim * 4)         # hidden temporary (f32)
    tm_cap = max(_SUBLANES, _round_down(_VMEM_TILE_BUDGET // per_row_bytes,
                                        _SUBLANES))
    max_tile = min(block_batch, tm_cap)

    if B <= max_tile and B < 1024:
        # One full-extent batch tile -> a single grid step (full-extent blocks
        # are exempt from the (8,128) divisibility rule).
        tm = B
    else:
        # Multiple sublane-aligned tiles. Always >= 2 tiles for large batches
        # so the "parallel" axis can shard across v7x's two TensorCores.
        n_tiles = max(2, pl.cdiv(B, max_tile))
        tm = _round_up(pl.cdiv(B, n_tiles), _SUBLANES)   # balanced tiles
    n_tiles = pl.cdiv(B, tm)
    Bp = n_tiles * tm
    # NOTE: no jnp.pad of x -- when Bp != B, Pallas masks the ragged last
    # input block; the corresponding garbage output rows are sliced off below.

    mxu_itemsize = jnp.dtype(w1_mxu.dtype).itemsize
    out_itemsize = jnp.dtype(out_dtype).itemsize
    flops = 2 * Bp * (in_dim * hidden_dim + hidden_dim * out_dim)
    bytes_accessed = (
        Bp * in_dim * 4                              # x (stays f32 in HBM)
        + in_dim * hidden_dim * mxu_itemsize         # w1 (resident, read once)
        + hidden_dim * out_dim * mxu_itemsize        # w2
        + (hidden_dim + out_dim) * 4                 # biases (f32)
        + Bp * out_dim * out_itemsize)               # output

    out = pl.pallas_call(
        proto_mlp_kernel,
        out_shape=jax.ShapeDtypeStruct((Bp, out_dim), out_dtype),
        grid=(n_tiles,),
        in_specs=[
            # streamed per batch tile
            pl.BlockSpec((tm, in_dim), lambda i: (i, 0)),
            # weights / biases: same block every step -> VMEM-resident
            pl.BlockSpec((in_dim, hidden_dim), lambda i: (0, 0)),
            pl.BlockSpec((1, hidden_dim), lambda i: (0, 0)),
            pl.BlockSpec((hidden_dim, out_dim), lambda i: (0, 0)),
            pl.BlockSpec((1, out_dim), lambda i: (0, 0)),
        ],
        out_specs=pl.BlockSpec((tm, out_dim), lambda i: (i, 0)),
        compiler_params=pltpu.CompilerParams(
            # batch tiles are independent -> shard across v7x's 2 TensorCores
            dimension_semantics=("parallel",)),
        cost_estimate=pl.CostEstimate(
            flops=flops, bytes_accessed=bytes_accessed, transcendentals=0),
    )(x, w1_mxu, b1, w2_mxu, b2)

    return out[:B] if Bp != B else out


def init_linear_params(key, in_dim, out_dim):
    """Deterministic nn.Linear-style init: U(-1/sqrt(in), 1/sqrt(in))."""
    kw, kb = jax.random.split(key)
    bound = 1.0 / (in_dim ** 0.5)
    # stored as (in_dim, out_dim) == transpose of PyTorch's (out, in) weight
    w = jax.random.uniform(kw, (in_dim, out_dim), jnp.float32, -bound, bound)
    b = jax.random.uniform(kb, (1, out_dim), jnp.float32, -bound, bound)
    return w, b


def init_prototypes(num_protos, comm_dim):
    """ProtoLayer init: 5 on the 'diagonal', -5 elsewhere (unused in forward)."""
    eye = jnp.eye(num_protos, comm_dim, dtype=jnp.float32)
    return 10.0 * eye - 5.0


if __name__ == "__main__":
    # Module config: ProtoNetwork(input_dim=32, out_dim=16, discrete=False,
    #                             num_layers=2, hidden_dim=64, num_protos=6,
    #                             constrain_out=False)
    input_dim, hidden_dim, out_dim, num_protos = 32, 64, 16, 6

    key = jax.random.PRNGKey(0)
    kx, k1, k2, kxl, kxr = jax.random.split(key, 5)

    w1, b1 = init_linear_params(k1, input_dim, hidden_dim)
    w2, b2 = init_linear_params(k2, hidden_dim, out_dim)
    prototypes = init_prototypes(num_protos, out_dim)  # not used in forward

    def ref_forward(xx):
        return jnp.maximum(xx @ w1 + b1, 0.0) @ w2 + b2

    # --- Small batch (typical per-agent use): one full-extent tile ---
    batch = 8
    x = jax.random.normal(kx, (batch, input_dim), jnp.float32)
    out = jax.block_until_ready(proto_network_forward(x, w1, b1, w2, b2))
    assert out.shape == (batch, out_dim)
    assert jnp.allclose(out, ref_forward(x), atol=1e-5, rtol=1e-5)

    # --- Large stacked batch: 2 balanced tiles (v7x megacore), resident
    #     weights, f32-exact path. ---
    big_batch = 1024
    xl = jax.random.normal(kxl, (big_batch, input_dim), jnp.float32)
    out_f32 = jax.block_until_ready(proto_network_forward(xl, w1, b1, w2, b2))
    assert out_f32.shape == (big_batch, out_dim)
    assert jnp.allclose(out_f32, ref_forward(xl), atol=1e-5, rtol=1e-5)

    # --- Ragged batch (not a tile multiple; no jnp.pad, Pallas masks the last
    #     block) + bf16 MXU weights with in-kernel x cast and f32 accumulation.
    #     bf16 operands => ~1e-2 relative error is expected. ---
    ragged_batch = 1000
    xr = jax.random.normal(kxr, (ragged_batch, input_dim), jnp.float32)
    out_bf16 = jax.block_until_ready(
        proto_network_forward(xr, w1, b1, w2, b2, block_batch=384,
                              use_bf16=True))
    assert out_bf16.shape == (ragged_batch, out_dim)
    assert jnp.allclose(out_bf16, ref_forward(xr), atol=1e-1, rtol=5e-2)

    print("KERNEL_OK")
</pallas_src>

<mosaic_0001>
module attributes {stable_mosaic.version = 11 : i64} {
  func.func @proto_mlp_kernel(%arg0: i32, %arg1: memref<8x32xf32, #tpu.memory_space<vmem>>, %arg2: memref<32x64xf32, #tpu.memory_space<vmem>>, %arg3: memref<1x64xf32, #tpu.memory_space<vmem>>, %arg4: memref<64x16xf32, #tpu.memory_space<vmem>>, %arg5: memref<1x16xf32, #tpu.memory_space<vmem>>, %arg6: memref<8x16xf32, #tpu.memory_space<vmem>>) attributes {dimension_semantics = [#tpu.dimension_semantics<parallel>], iteration_bounds = array<i64: 1>, scalar_prefetch = 0 : i64, scratch_operands = 0 : i64, tpu.core_type = #tpu.core_type<tc>, window_params = [{transform_indices = @transform_0, window_bounds = array<i64: 8, 32>}, {pipeline_mode = #tpu.pipeline_mode<synchronous>, transform_indices = @transform_1, window_bounds = array<i64: 32, 64>}, {pipeline_mode = #tpu.pipeline_mode<synchronous>, transform_indices = @transform_2, window_bounds = array<i64: 1, 64>}, {pipeline_mode = #tpu.pipeline_mode<synchronous>, transform_indices = @transform_3, window_bounds = array<i64: 64, 16>}, {pipeline_mode = #tpu.pipeline_mode<synchronous>, transform_indices = @transform_4, window_bounds = array<i64: 1, 16>}, {transform_indices = @transform_5, window_bounds = array<i64: 8, 16>}]} {
    %c0 = arith.constant 0 : index
    %c0_0 = arith.constant 0 : index
    %0 = vector.load %arg1[%c0, %c0_0] : memref<8x32xf32, #tpu.memory_space<vmem>>, vector<8x32xf32>
    %c0_1 = arith.constant 0 : index
    %c0_2 = arith.constant 0 : index
    %1 = vector.load %arg2[%c0_1, %c0_2] : memref<32x64xf32, #tpu.memory_space<vmem>>, vector<32x64xf32>
    %cst = arith.constant dense<0.000000e+00> : vector<8x64xf32>
    %2 = tpu.matmul %0, %1, %cst {dimension_numbers = #tpu.dot_dimension_numbers<[1], [0], [0], [1], [0, 0, 1, 1], [], []>} : vector<8x32xf32>, vector<32x64xf32>, vector<8x64xf32> -> vector<8x64xf32>
    %c0_3 = arith.constant 0 : index
    %c0_4 = arith.constant 0 : index
    %3 = vector.load %arg3[%c0_3, %c0_4] : memref<1x64xf32, #tpu.memory_space<vmem>>, vector<1x64xf32>
    %4 = vector.broadcast %3 : vector<1x64xf32> to vector<8x64xf32>
    %5 = arith.addf %2, %4 : vector<8x64xf32>
    %cst_5 = arith.constant 0.000000e+00 : f32
    %6 = vector.broadcast %cst_5 : f32 to vector<8x64xf32>
    %7 = arith.maximumf %5, %6 : vector<8x64xf32>
    %c0_6 = arith.constant 0 : index
    %c0_7 = arith.constant 0 : index
    %8 = vector.load %arg4[%c0_6, %c0_7] : memref<64x16xf32, #tpu.memory_space<vmem>>, vector<64x16xf32>
    %cst_8 = arith.constant dense<0.000000e+00> : vector<8x16xf32>
    %9 = tpu.matmul %7, %8, %cst_8 {dimension_numbers = #tpu.dot_dimension_numbers<[1], [0], [0], [1], [0, 0, 1, 1], [], []>} : vector<8x64xf32>, vector<64x16xf32>, vector<8x16xf32> -> vector<8x16xf32>
    %c0_9 = arith.constant 0 : index
    %c0_10 = arith.constant 0 : index
    %10 = vector.load %arg5[%c0_9, %c0_10] : memref<1x16xf32, #tpu.memory_space<vmem>>, vector<1x16xf32>
    %11 = vector.broadcast %10 : vector<1x16xf32> to vector<8x16xf32>
    %12 = arith.addf %9, %11 : vector<8x16xf32>
    %c0_11 = arith.constant 0 : index
    %c0_12 = arith.constant 0 : index
    %13 = vector.load %arg6[%c0_11, %c0_12] : memref<8x16xf32, #tpu.memory_space<vmem>>, vector<8x16xf32>
    tpu.vector_store %arg6[%c0_11, %c0_12], %12 {strides = array<i32>} : memref<8x16xf32, #tpu.memory_space<vmem>>, vector<8x16xf32>,
    return
  }
  func.func @transform_0(%arg0: i32) -> (i32, i32) {
    %c0_i32 = arith.constant 0 : i32
    %c0_i32_0 = arith.constant 0 : i32
    return %arg0, %c0_i32 : i32, i32
  }
  func.func @transform_1(%arg0: i32) -> (i32, i32) {
    %c0_i32 = arith.constant 0 : i32
    %c0_i32_0 = arith.constant 0 : i32
    %c0_i32_1 = arith.constant 0 : i32
    return %c0_i32, %c0_i32_0 : i32, i32
  }
  func.func @transform_2(%arg0: i32) -> (i32, i32) {
    %c0_i32 = arith.constant 0 : i32
    %c0_i32_0 = arith.constant 0 : i32
    %c0_i32_1 = arith.constant 0 : i32
    return %c0_i32, %c0_i32_0 : i32, i32
  }
  func.func @transform_3(%arg0: i32) -> (i32, i32) {
    %c0_i32 = arith.constant 0 : i32
    %c0_i32_0 = arith.constant 0 : i32
    %c0_i32_1 = arith.constant 0 : i32
    return %c0_i32, %c0_i32_0 : i32, i32
  }
  func.func @transform_4(%arg0: i32) -> (i32, i32) {
    %c0_i32 = arith.constant 0 : i32
    %c0_i32_0 = arith.constant 0 : i32
    %c0_i32_1 = arith.constant 0 : i32
    return %c0_i32, %c0_i32_0 : i32, i32
  }
  func.func @transform_5(%arg0: i32) -> (i32, i32) {
    %c0_i32 = arith.constant 0 : i32
    %c0_i32_0 = arith.constant 0 : i32
    return %arg0, %c0_i32 : i32, i32
  }
}

</mosaic_0001>

<bundles_post_ra>
// kernel: tpu_custom_call.1
= control target key start
LH: loop header
LB: loop body
LE: loop exit
PB: predicated region body
PF: predicated region fallthrough
CT: control target
= control target key end

     0   :  { %v307_v3 = vmov 0.0|0.0   ;;  %vm308_vm0 = vmmov 0   ;;  %v309_v6 = vmov 0.0   ;;  %s398_s0 = inlined_call_operand.vmem [shape: f32[8,32], index: 0, kind: input, shape index: {}]   ;;  %s399_s1 = inlined_call_operand.vmem [shape: f32[32,64], index: 1, kind: input, shape index: {}]   ;;  %s400_s2 = inlined_call_operand.vmem [shape: f32[1,64], index: 2, kind: input, shape index: {}]   ;;  %s401_s3 = inlined_call_operand.vmem [shape: f32[64,16], index: 3, kind: input, shape index: {}]   ;;  %s402_s4 = inlined_call_operand.vmem [shape: f32[1,16], index: 4, kind: input, shape index: {}]   ;;  %s403_s5 = inlined_call_operand.hbm [shape: f32[8,16], index: 5, kind: output, shape index: {}]  }
   0x1   :  { %v22_v0 = vld [vmem:[%s399_s1] sm:$0xff]  ;;  %v23_v1 = vld [vmem:[%s399_s1 + $0x8] sm:$0xff]  ;;  %v24_v2 = vld [vmem:[%s399_s1 + $0x10] sm:$0xff]  ;;  %261 = vmatprep.subr.bf16.mxu0 %v307_v3  ;;  %239 = vmatprep.mubr.msk.f32.mxu0 %vm308_vm0, %v309_v6 }
   0x2   :  { %v262_v4 = vpack.c.bf16 %v23_v1, %v22_v0  ;;  %v25_v5 = vld [vmem:[%s399_s1 + $0x18] sm:$0xff]  ;;  %v108_v7 = vld [vmem:[%s401_s3] sm:$0xff]  ;;  %267 = vmatprep.subr.bf16.mxu1 %v307_v3  ;;  %v109_v8 = vld [vmem:[%s401_s3 + $0x8] sm:$0xff]  ;;  %258 = vmatprep.mubr.msk.f32.mxu1 %vm308_vm0, %v309_v6 }
   0x3   :  { %v110_v9 = vld [vmem:[%s401_s3 + $0x10] sm:$0xff]  ;;  %v111_v10 = vld [vmem:[%s401_s3 + $0x18] sm:$0xff]  ;;  %v265_v11 = vpack.c.bf16 %v25_v5, %v24_v2  ;;  %v268_v12 = vpack.c.bf16 %v109_v8, %v108_v7 }
   0x4   :  { %263 = vmatpush3.bf16.msra.mxu0 %v262_v4 }
   0x5   :  { %264 = vmatprep.subr.bf16.mxu0 %v307_v3 }
   0x6   :  { %10 = vsyncpa [#allocation3], 0  ;;  %269 = vmatpush3.bf16.msra.mxu1 %v268_v12  ;;  %v271_v13 = vpack.c.bf16 %v111_v10, %v110_v9  ;;  %v112_v14 = vld [vmem:[%s401_s3 + $0x20] sm:$0xff]  ;;  %v113_v15 = vld [vmem:[%s401_s3 + $0x28] sm:$0xff]  ;;  %vm33_vm1 = vcmask 261120   ;;  %vm123_vm2 = vcmask 523264  }
   0x7   :  { %270 = vmatprep.subr.bf16.mxu1 %v307_v3  ;;  %v21_v16 = vld [vmem:[%s398_s0] sm:$0xff]  ;;  %v274_v17 = vpack.c.bf16 %v113_v15, %v112_v14  ;;  %v114_v18 = vld [vmem:[%s401_s3 + $0x30] sm:$0xff]  ;;  %v115_v19 = vld [vmem:[%s401_s3 + $0x38] sm:$0xff]  ;;  %s310_s21 = smov [#allocation2]   ;;  %vm197_vm3 = vcmask 130048  }
   0x8   :  { %266 = vmatpush3.bf16.msra.mxu0 %v265_v11  ;;  %v277_v20 = vpack.c.bf16 %v115_v19, %v114_v18  ;;  %v213_v21 = vld [vmem:[%s400_s2] ss:$0 sm:$0xff]  ;;  %s205_s22 = sshll.u32 %s310_s21, 4  ;;  %s206_s22 = int_to_ptr.vmem [resolvable:$true] %s205_s22 }
   0x9   :  { %v215_v26 = vld [vmem:[%s402_s4] ss:$0 sm:$0xff]  ;;  %s283_s3 = scalar_lea.vmem %s206_s22, 128  ;;  %p288_p1 = scmp.lt.s32.totalorder %s206_s22, %s206_s22 }
   0xa   :  { %272 = vmatpush3.bf16.msra.mxu1 %v271_v13  ;;  %p284_p0 = scmp.ne.s32.totalorder %s206_s22, %s283_s3  ;;  %p289_p2 = scmp.lt.s32.totalorder %s283_s3, %s283_s3 }
   0xb   :  { %240 = vmatmul.mubr.msk.f32.vlgmr.msra.gmra.mrb[0].mxu0 %vm33_vm1, %v21_v16  ;;  %273 = vmatprep.subr.bf16.mxu1 %v307_v3 }
   0xc   :  { %p290_p3 = por %p289_p2, %p288_p1 }
   0xe   :  { %275 = vmatpush3.bf16.msra.mxu1 %v274_v17  ;;  %p291_p4 = pnand %p290_p3, %p284_p0 }
   0xf   :  { %276 = vmatprep.subr.bf16.mxu1 %v307_v3 }
  0x12   :  { %278 = vmatpush3.bf16.msra.mxu1 %v277_v20 }
  0xde   :  { %v103_v22 = vpop.f32.mrb[0].mxu0 }
  0xdf   :  { %v104_v23 = vadd.f32 %v213_v21, %v103_v22  ;;  %v241_v24 = vpop.f32.mrb[1].mxu0 }
  0xe1   :  { %v107_v25 = vmax.f32 %v104_v23, 0.0 }
  0xe3   :  { %259 = vmatmul.mubr.msk.f32.vlgmr.msra.gmra.mrb[0].mxu1 %vm123_vm2, %v107_v25 }
 0x1b6   :  { %v193_v27 = vpop.f32.mrb[0].mxu1 }
 0x1b7   :  { %v194_v28 = vadd.f32 %v215_v26, %v193_v27  ;;  %v260_v29 = vpop.f32.mrb[1].mxu1 }
 0x1b9   :  { %198 = vst.msk [vmem:[#allocation2] sm:$0xff] %vm197_vm3, %v194_v28 }
 0x1ba   :  { %294 = shalt.err (!%p291_p4)
}
 0x1bb   :  { %s295_s24 = scalar_lea.hbm %s403_s5, 128 }
 0x1bc   :  { %p296_p5 = scmp.ne.s32.totalorder %s403_s5, %s295_s24  ;;  %p299_p6 = scmp.lt.u32.totalorder %s295_s24, %s403_s5 }
 0x1be   :  { %p301_p7 = pnand %p299_p6, %p296_p5 }
 0x1c0   :  { %304 = shalt.err (!%p301_p7)
}
 0x1c1   :  { %208 = dma.vmem_to_hbm [thread:$0]  %s206_s22, 128, %s403_s5, [#allocation3]  }
 0x1c2   :  { %305 = dma.done.wait [#allocation3], 128  }
 0x1c3   :  { %306 = vsyncadd [#allocation3], 4294967168 }
 0x1c4   :  { %212 = vsyncpa [#allocation3], 1 }

</bundles_post_ra>
